<compile_context>
chip_gen: v6e
topology: v6e:2x2x1
jax: 0.10.0
libtpu: 0.0.40
codegen_flags: <defaults>
</compile_context>

<pallas_src>
import math

import jax
import jax.numpy as jnp
from jax.experimental import pallas as pl
from jax.experimental.pallas import tpu as pltpu


def _round_up(n, m):
    return ((n + m - 1) // m) * m


def _cdiv(n, m):
    return (n + m - 1) // m


def _critic_kernel(x_ref, a_ref, w1_ref, b1_ref, w2x_ref, w2a_ref, b2_ref,
                   w3_ref, b3_ref, o_ref):
    wdt = w1_ref.dtype

    # fc1 + ReLU: MXU matmul, f32 accumulation, f32 bias add.
    h1 = jnp.dot(x_ref[...].astype(wdt), w1_ref[...],
                 preferred_element_type=jnp.float32)
    h1 = jnp.maximum(h1 + b1_ref[...], 0.0)

    # fc2 on concat([h1, a]) folded into a split matmul, + ReLU.
    h2 = jnp.dot(h1.astype(wdt), w2x_ref[...],
                 preferred_element_type=jnp.float32)
    h2 = h2 + jnp.dot(a_ref[...].astype(wdt), w2a_ref[...],
                      preferred_element_type=jnp.float32)
    h2 = jnp.maximum(h2 + b2_ref[...], 0.0)

    # fc3 (out_features == 1): per-row dot product as VPU multiply + lane
    # reduction (XLU) in f32 -- output stays a narrow (tm, 1) column, so we never
    # materialize or write back a 128-wide padded result.
    out = jnp.sum(h2 * w3_ref[...], axis=-1, keepdims=True)
    o_ref[...] = out + b3_ref[0, 0]          # b3 is an SMEM scalar


def _choose_batch_tile(batch, tm_request):
    """Pick a legal, well-sized batch tile.

    * 128-aligned (trivially satisfies the sublane constraint) and capped at 2048
      so f32/bf16 intermediates stay well inside VMEM on every generation;
      a single tile equal to the full batch is used for small batches (a
      full-dim block is always legal, even if not a multiple of 8).
    * at least two grid steps once the batch is big enough, so the "parallel"
      batch axis can shard across both TensorCores on v7x.
    """
    tm_max = max(128, min(_round_up(tm_request, 128), 2048))
    if batch <= 256:
        return batch
    n_tiles = max(2, _cdiv(batch, tm_max))
    return min(tm_max, _round_up(_cdiv(batch, n_tiles), 128))


def critic_forward(x, a, params, *, tm=1024):
    """Critic forward. x: (B, obs_in), a: (B, act_in) -> (B, 1) float32.

    `params` come from `init_critic_params` / `cast_critic_params`; matmul
    weights may be bf16 (default, MXU-native) or f32, biases are always f32.
    """
    w1, b1, w2x, w2a, b2, w3, b3 = params
    B, obs_in = x.shape
    act_in = a.shape[1]
    h1p = w1.shape[1]
    h2p = w2x.shape[1]

    tm_eff = _choose_batch_tile(B, tm)
    grid = (_cdiv(B, tm_eff),)   # partial tail tile: OOB output rows are masked

    in_specs = [
        pl.BlockSpec((tm_eff, obs_in), lambda i: (i, 0)),   # x    (batch streamed)
        pl.BlockSpec((tm_eff, act_in), lambda i: (i, 0)),   # a    (batch streamed)
        pl.BlockSpec((obs_in, h1p), lambda i: (0, 0)),      # W1   (VMEM resident)
        pl.BlockSpec((1, h1p), lambda i: (0, 0)),           # b1
        pl.BlockSpec((h1p, h2p), lambda i: (0, 0)),         # W2x
        pl.BlockSpec((act_in, h2p), lambda i: (0, 0)),      # W2a
        pl.BlockSpec((1, h2p), lambda i: (0, 0)),           # b2
        pl.BlockSpec((1, h2p), lambda i: (0, 0)),           # W3 row (lane-dense)
        pl.BlockSpec(memory_space=pltpu.MemorySpace.SMEM),  # b3 scalar
    ]
    out_spec = pl.BlockSpec((tm_eff, 1), lambda i: (i, 0))  # narrow (tm,1) store

    return pl.pallas_call(
        _critic_kernel,
        out_shape=jax.ShapeDtypeStruct((B, 1), jnp.float32),
        grid=grid,
        in_specs=in_specs,
        out_specs=out_spec,
        compiler_params=pltpu.CompilerParams(
            dimension_semantics=("parallel",),
            vmem_limit_bytes=32 * 1024 * 1024),
    )(x, a, w1, b1, w2x, w2a, b2, w3, b3)


def cast_critic_params(params, dtype):
    """Cast the matmul weights to `dtype` ONCE (cache the result; do not cast per
    call).  Biases, the fc3 row and fc3 bias stay f32 so bias adds and the final
    reduction are exact on the f32 accumulators."""
    w1, b1, w2x, w2a, b2, w3, b3 = params
    return (w1.astype(dtype), b1, w2x.astype(dtype), w2a.astype(dtype), b2, w3, b3)


def init_critic_params(key, obs_size, n_actions, num_agents,
                       hidden1=400, hidden2=300, dtype=jnp.bfloat16):
    """PyTorch nn.Linear init U(-1/sqrt(fan_in), 1/sqrt(fan_in)).

    Weights are stored as (in_features, out_features); fc2's weight is split into
    the h1 part and the action part (exact concat folding).  Hidden dims are
    zero-padded to 128-lane multiples (exact).  fc3 is stored as a lane-dense
    (1, hidden2_padded) f32 row plus a (1, 1) f32 bias.  Matmul weights are
    returned in `dtype` (default bf16, the MXU-native path)."""
    obs_in = obs_size * num_agents
    act_in = n_actions * num_agents
    h1p = _round_up(hidden1, 128)   # 400 -> 512
    h2p = _round_up(hidden2, 128)   # 300 -> 384

    def linear(k, fan_in, fan_out):
        kw, kb = jax.random.split(k)
        bound = 1.0 / math.sqrt(fan_in)
        w = jax.random.uniform(kw, (fan_in, fan_out), jnp.float32, -bound, bound)
        b = jax.random.uniform(kb, (1, fan_out), jnp.float32, -bound, bound)
        return w, b

    k1, k2, k3 = jax.random.split(key, 3)
    w1, b1 = linear(k1, obs_in, hidden1)
    w2_full, b2 = linear(k2, hidden1 + act_in, hidden2)
    w2x, w2a = w2_full[:hidden1], w2_full[hidden1:]
    w3, b3 = linear(k3, hidden2, 1)

    # Exact zero-padding to lane multiples.
    w1p = jnp.zeros((obs_in, h1p), jnp.float32).at[:, :hidden1].set(w1)
    b1p = jnp.zeros((1, h1p), jnp.float32).at[:, :hidden1].set(b1)
    w2xp = jnp.zeros((h1p, h2p), jnp.float32).at[:hidden1, :hidden2].set(w2x)
    w2ap = jnp.zeros((act_in, h2p), jnp.float32).at[:, :hidden2].set(w2a)
    b2p = jnp.zeros((1, h2p), jnp.float32).at[:, :hidden2].set(b2)
    w3p = jnp.zeros((1, h2p), jnp.float32).at[:, :hidden2].set(w3.T)
    b3p = b3.reshape(1, 1)

    params_f32 = (w1p, b1p, w2xp, w2ap, b2p, w3p, b3p)
    return cast_critic_params(params_f32, dtype)


def critic_reference(x, a, params):
    """Plain-JAX f32 reference matching the PyTorch module (split form is an
    exact rewrite of the concat; zero-padding is exact)."""
    w1, b1, w2x, w2a, b2, w3, b3 = [jnp.asarray(p, jnp.float32) for p in params]
    h1 = jax.nn.relu(x @ w1 + b1)
    h2 = jax.nn.relu(h1 @ w2x + a @ w2a + b2)
    return jnp.sum(h2 * w3, axis=-1, keepdims=True) + b3


if __name__ == "__main__":
    obs_size, n_actions, num_agents = 16, 4, 2
    hidden1, hidden2 = 400, 300

    key = jax.random.PRNGKey(0)
    kx, ka, kp = jax.random.split(key, 3)

    # Small deterministic example (B=8 -> single full-batch tile).
    B = 8
    x = jax.random.normal(kx, (B, obs_size * num_agents), jnp.float32)
    a = jax.random.normal(ka, (B, n_actions * num_agents), jnp.float32)

    # f32 params for the exact check; bf16 copy cached once for the fast path.
    params_f32 = init_critic_params(kp, obs_size, n_actions, num_agents,
                                    hidden1=hidden1, hidden2=hidden2,
                                    dtype=jnp.float32)
    params_bf16 = cast_critic_params(params_f32, jnp.bfloat16)

    ref = critic_reference(x, a, params_f32)

    # Exact f32 weight path.
    out_f32 = jax.block_until_ready(critic_forward(x, a, params_f32))
    assert out_f32.shape == (B, 1), out_f32.shape
    assert jnp.allclose(out_f32, ref, atol=1e-3, rtol=1e-3), (out_f32, ref)

    # Default bf16 weight path (f32 accumulation) -- expected ~1e-2 rel error.
    out_bf16 = jax.block_until_ready(critic_forward(x, a, params_bf16))
    assert out_bf16.shape == (B, 1), out_bf16.shape
    assert bool(jnp.all(jnp.isfinite(out_bf16)))
    assert jnp.allclose(out_bf16, ref, atol=1e-1, rtol=1e-1), (out_bf16, ref)

    # Larger batch: multi-tile grid + partial tail tile, no host-side padding.
    B2 = 300
    kx2, ka2 = jax.random.split(jax.random.PRNGKey(1))
    x2 = jax.random.normal(kx2, (B2, obs_size * num_agents), jnp.float32)
    a2 = jax.random.normal(ka2, (B2, n_actions * num_agents), jnp.float32)
    out2 = jax.block_until_ready(critic_forward(x2, a2, params_bf16))
    ref2 = critic_reference(x2, a2, params_f32)
    assert out2.shape == (B2, 1), out2.shape
    assert jnp.allclose(out2, ref2, atol=1e-1, rtol=1e-1)

    print("KERNEL_OK")
</pallas_src>

<mosaic_0001>
module attributes {stable_mosaic.version = 11 : i64} {
  func.func @_critic_kernel(%arg0: i32, %arg1: memref<8x32xf32, #tpu.memory_space<vmem>>, %arg2: memref<8x8xf32, #tpu.memory_space<vmem>>, %arg3: memref<32x512xf32, #tpu.memory_space<vmem>>, %arg4: memref<1x512xf32, #tpu.memory_space<vmem>>, %arg5: memref<512x384xf32, #tpu.memory_space<vmem>>, %arg6: memref<8x384xf32, #tpu.memory_space<vmem>>, %arg7: memref<1x384xf32, #tpu.memory_space<vmem>>, %arg8: memref<1x384xf32, #tpu.memory_space<vmem>>, %arg9: memref<1x1xf32, #tpu.memory_space<smem>>, %arg10: memref<8x1xf32, #tpu.memory_space<vmem>>) attributes {dimension_semantics = [#tpu.dimension_semantics<parallel>], iteration_bounds = array<i64: 1>, scalar_prefetch = 0 : i64, scratch_operands = 0 : i64, tpu.core_type = #tpu.core_type<tc>, window_params = [{transform_indices = @transform_0, window_bounds = array<i64: 8, 32>}, {transform_indices = @transform_1, window_bounds = array<i64: 8, 8>}, {pipeline_mode = #tpu.pipeline_mode<synchronous>, transform_indices = @transform_2, window_bounds = array<i64: 32, 512>}, {pipeline_mode = #tpu.pipeline_mode<synchronous>, transform_indices = @transform_3, window_bounds = array<i64: 1, 512>}, {pipeline_mode = #tpu.pipeline_mode<synchronous>, transform_indices = @transform_4, window_bounds = array<i64: 512, 384>}, {pipeline_mode = #tpu.pipeline_mode<synchronous>, transform_indices = @transform_5, window_bounds = array<i64: 8, 384>}, {pipeline_mode = #tpu.pipeline_mode<synchronous>, transform_indices = @transform_6, window_bounds = array<i64: 1, 384>}, {pipeline_mode = #tpu.pipeline_mode<synchronous>, transform_indices = @transform_7, window_bounds = array<i64: 1, 384>}, {transform_indices = @transform_8, window_bounds = array<i64: 1, 1>}, {transform_indices = @transform_9, window_bounds = array<i64: 8, 1>}]} {
    %c0 = arith.constant 0 : index
    %c0_0 = arith.constant 0 : index
    %0 = vector.load %arg1[%c0, %c0_0] : memref<8x32xf32, #tpu.memory_space<vmem>>, vector<8x32xf32>
    %c0_1 = arith.constant 0 : index
    %c0_2 = arith.constant 0 : index
    %1 = vector.load %arg3[%c0_1, %c0_2] : memref<32x512xf32, #tpu.memory_space<vmem>>, vector<32x512xf32>
    %cst = arith.constant dense<0.000000e+00> : vector<8x512xf32>
    %2 = tpu.matmul %0, %1, %cst {dimension_numbers = #tpu.dot_dimension_numbers<[1], [0], [0], [1], [0, 0, 1, 1], [], []>} : vector<8x32xf32>, vector<32x512xf32>, vector<8x512xf32> -> vector<8x512xf32>
    %c0_3 = arith.constant 0 : index
    %c0_4 = arith.constant 0 : index
    %3 = vector.load %arg4[%c0_3, %c0_4] : memref<1x512xf32, #tpu.memory_space<vmem>>, vector<1x512xf32>
    %4 = vector.broadcast %3 : vector<1x512xf32> to vector<8x512xf32>
    %5 = arith.addf %2, %4 : vector<8x512xf32>
    %cst_5 = arith.constant 0.000000e+00 : f32
    %6 = vector.broadcast %cst_5 : f32 to vector<8x512xf32>
    %7 = arith.maximumf %5, %6 : vector<8x512xf32>
    %c0_6 = arith.constant 0 : index
    %c0_7 = arith.constant 0 : index
    %8 = vector.load %arg5[%c0_6, %c0_7] : memref<512x384xf32, #tpu.memory_space<vmem>>, vector<512x384xf32>
    %cst_8 = arith.constant dense<0.000000e+00> : vector<8x384xf32>
    %9 = tpu.matmul %7, %8, %cst_8 {dimension_numbers = #tpu.dot_dimension_numbers<[1], [0], [0], [1], [0, 0, 1, 1], [], []>} : vector<8x512xf32>, vector<512x384xf32>, vector<8x384xf32> -> vector<8x384xf32>
    %c0_9 = arith.constant 0 : index
    %c0_10 = arith.constant 0 : index
    %10 = vector.load %arg2[%c0_9, %c0_10] : memref<8x8xf32, #tpu.memory_space<vmem>>, vector<8x8xf32>
    %c0_11 = arith.constant 0 : index
    %c0_12 = arith.constant 0 : index
    %11 = vector.load %arg6[%c0_11, %c0_12] : memref<8x384xf32, #tpu.memory_space<vmem>>, vector<8x384xf32>
    %cst_13 = arith.constant dense<0.000000e+00> : vector<8x384xf32>
    %12 = tpu.matmul %10, %11, %cst_13 {dimension_numbers = #tpu.dot_dimension_numbers<[1], [0], [0], [1], [0, 0, 1, 1], [], []>} : vector<8x8xf32>, vector<8x384xf32>, vector<8x384xf32> -> vector<8x384xf32>
    %13 = arith.addf %9, %12 : vector<8x384xf32>
    %c0_14 = arith.constant 0 : index
    %c0_15 = arith.constant 0 : index
    %14 = vector.load %arg7[%c0_14, %c0_15] : memref<1x384xf32, #tpu.memory_space<vmem>>, vector<1x384xf32>
    %15 = vector.broadcast %14 : vector<1x384xf32> to vector<8x384xf32>
    %16 = arith.addf %13, %15 : vector<8x384xf32>
    %cst_16 = arith.constant 0.000000e+00 : f32
    %17 = vector.broadcast %cst_16 : f32 to vector<8x384xf32>
    %18 = arith.maximumf %16, %17 : vector<8x384xf32>
    %c0_17 = arith.constant 0 : index
    %c0_18 = arith.constant 0 : index
    %19 = vector.load %arg8[%c0_17, %c0_18] : memref<1x384xf32, #tpu.memory_space<vmem>>, vector<1x384xf32>
    %20 = vector.broadcast %19 : vector<1x384xf32> to vector<8x384xf32>
    %21 = arith.mulf %18, %20 : vector<8x384xf32>
    %cst_19 = arith.constant dense<0.000000e+00> : vector<8xf32>
    %22 = vector.multi_reduction <add>, %21, %cst_19 [1] : vector<8x384xf32> to vector<8xf32>
    %23 = vector.shape_cast %22 : vector<8xf32> to vector<8x1xf32>
    %c0_20 = arith.constant 0 : index
    %c0_21 = arith.constant 0 : index
    %24 = memref.load %arg9[%c0_20, %c0_21] : memref<1x1xf32, #tpu.memory_space<smem>>
    %25 = vector.broadcast %24 : f32 to vector<8x1xf32>
    %26 = arith.addf %23, %25 : vector<8x1xf32>
    %c0_22 = arith.constant 0 : index
    %c0_23 = arith.constant 0 : index
    %27 = vector.load %arg10[%c0_22, %c0_23] : memref<8x1xf32, #tpu.memory_space<vmem>>, vector<8x1xf32>
    tpu.vector_store %arg10[%c0_22, %c0_23], %26 {strides = array<i32>} : memref<8x1xf32, #tpu.memory_space<vmem>>, vector<8x1xf32>,
    return
  }
  func.func @transform_0(%arg0: i32) -> (i32, i32) {
    %c0_i32 = arith.constant 0 : i32
    %c0_i32_0 = arith.constant 0 : i32
    return %arg0, %c0_i32 : i32, i32
  }
  func.func @transform_1(%arg0: i32) -> (i32, i32) {
    %c0_i32 = arith.constant 0 : i32
    %c0_i32_0 = arith.constant 0 : i32
    return %arg0, %c0_i32 : i32, i32
  }
  func.func @transform_2(%arg0: i32) -> (i32, i32) {
    %c0_i32 = arith.constant 0 : i32
    %c0_i32_0 = arith.constant 0 : i32
    %c0_i32_1 = arith.constant 0 : i32
    return %c0_i32, %c0_i32_0 : i32, i32
  }
  func.func @transform_3(%arg0: i32) -> (i32, i32) {
    %c0_i32 = arith.constant 0 : i32
    %c0_i32_0 = arith.constant 0 : i32
    %c0_i32_1 = arith.constant 0 : i32
    return %c0_i32, %c0_i32_0 : i32, i32
  }
  func.func @transform_4(%arg0: i32) -> (i32, i32) {
    %c0_i32 = arith.constant 0 : i32
    %c0_i32_0 = arith.constant 0 : i32
    %c0_i32_1 = arith.constant 0 : i32
    return %c0_i32, %c0_i32_0 : i32, i32
  }
  func.func @transform_5(%arg0: i32) -> (i32, i32) {
    %c0_i32 = arith.constant 0 : i32
    %c0_i32_0 = arith.constant 0 : i32
    %c0_i32_1 = arith.constant 0 : i32
    return %c0_i32, %c0_i32_0 : i32, i32
  }
  func.func @transform_6(%arg0: i32) -> (i32, i32) {
    %c0_i32 = arith.constant 0 : i32
    %c0_i32_0 = arith.constant 0 : i32
    %c0_i32_1 = arith.constant 0 : i32
    return %c0_i32, %c0_i32_0 : i32, i32
  }
  func.func @transform_7(%arg0: i32) -> (i32, i32) {
    %c0_i32 = arith.constant 0 : i32
    %c0_i32_0 = arith.constant 0 : i32
    %c0_i32_1 = arith.constant 0 : i32
    return %c0_i32, %c0_i32_0 : i32, i32
  }
  func.func @transform_8(%arg0: i32) -> (i32, i32) {
    %c0_i32 = arith.constant 0 : i32
    %c0_i32_0 = arith.constant 0 : i32
    %c0_i32_1 = arith.constant 0 : i32
    return %c0_i32, %c0_i32_0 : i32, i32
  }
  func.func @transform_9(%arg0: i32) -> (i32, i32) {
    %c0_i32 = arith.constant 0 : i32
    %c0_i32_0 = arith.constant 0 : i32
    return %arg0, %c0_i32 : i32, i32
  }
}

</mosaic_0001>

<bundles_post_ra>
// kernel: tpu_custom_call.1
= control target key start
LH: loop header
LB: loop body
LE: loop exit
PB: predicated region body
PF: predicated region fallthrough
CT: control target
= control target key end

     0   :  { %15 = vsyncpa [#allocation4], 0  ;;  %s1287_s0 = inlined_call_operand.hbm [shape: f32[8,32], index: 0, kind: input, shape index: {}]   ;;  %s1288_s1 = inlined_call_operand.hbm [shape: f32[8,8], index: 1, kind: input, shape index: {}]   ;;  %s1289_s2 = inlined_call_operand.hbm [shape: f32[32,512], index: 2, kind: input, shape index: {}]   ;;  %s1290_s3 = inlined_call_operand.vmem [shape: f32[1,512], index: 3, kind: input, shape index: {}]   ;;  %s1291_s4 = inlined_call_operand.hbm [shape: f32[512,384], index: 4, kind: input, shape index: {}]   ;;  %s1292_s5 = inlined_call_operand.hbm [shape: f32[8,384], index: 5, kind: input, shape index: {}]   ;;  %s1293_s6 = inlined_call_operand.vmem [shape: f32[1,384], index: 6, kind: input, shape index: {}]   ;;  %s1294_s7 = inlined_call_operand.vmem [shape: f32[1,384], index: 7, kind: input, shape index: {}]   ;;  %s1295_s8 = inlined_call_operand.<no memory space> [shape: f32[1,1], index: 8, kind: input, shape index: {}]   ;;  %s1296_s9 = inlined_call_operand.vmem [shape: f32[8,1], index: 9, kind: output, shape index: {}]  }
   0x1   :  { %16 = vsyncpa [#allocation6], 0 }
   0x2   :  { %17 = vsyncpa [#allocation9], 0  ;;  %s1164_s30 = smov [#allocation5]   ;;  %s1165_s11 = smov [#allocation8]  }
   0x3   :  { %s34_s10 = sshll.u32 %s1164_s30, 4  ;;  %s57_s12 = sshll.u32 %s1165_s11, 4  ;;  %s35_s10 = int_to_ptr.vmem [resolvable:$true] %s34_s10  ;;  %s58_s12 = int_to_ptr.vmem [resolvable:$true] %s57_s12 }
   0x4   :  { %s1066_s13 = scalar_lea.vmem %s35_s10, 128  ;;  %p1071_p1 = scmp.lt.s32.totalorder %s35_s10, %s35_s10 }
   0x5   :  { %p1067_p0 = scmp.ne.s32.totalorder %s35_s10, %s1066_s13  ;;  %p1072_p2 = scmp.lt.s32.totalorder %s1066_s13, %s1066_s13 }
   0x7   :  { %p1073_p3 = por %p1072_p2, %p1071_p1 }
   0x9   :  { %p1074_p4 = pnand %p1073_p3, %p1067_p0 }
   0xb   :  { %1077 = shalt.err (!%p1074_p4)
}
   0xc   :  { %37 = dma.hbm_to_vmem [thread:$0]  %s1288_s1, 128, %s35_s10, [#allocation6]  }
   0xd   :  { %s1086_s16 = scalar_lea.vmem %s58_s12, 24576  ;;  %p1091_p6 = scmp.lt.s32.totalorder %s58_s12, %s58_s12 }
   0xe   :  { %p1087_p5 = scmp.ne.s32.totalorder %s58_s12, %s1086_s16  ;;  %p1092_p7 = scmp.lt.s32.totalorder %s1086_s16, %s1086_s16 }
  0x10   :  { %p1093_p8 = por %p1092_p7, %p1091_p6 }
  0x12   :  { %p1094_p9 = pnand %p1093_p8, %p1087_p5 }
  0x14   :  { %1097 = shalt.err (!%p1094_p9)
}
  0x15   :  { %s1166_s17 = smov 384   ;;  %s1167_s18 = smov 24  }
  0x16   :  { %63 = dma.hbm_to_vmem [thread:$0]  %s1291_s4, 24576, %s58_s12, [#allocation9], %s1166_s17, %s1166_s17, %s1167_s18  }
  0x17   :  { %s1168_s21 = smov [#allocation3]   ;;  %s1169_s23 = smov [#allocation7]  }
  0x18   :  { %s24_s22 = sshll.u32 %s1168_s21, 4  ;;  %s43_s24 = sshll.u32 %s1169_s23, 4  ;;  %s25_s22 = int_to_ptr.vmem [resolvable:$true] %s24_s22  ;;  %s44_s24 = int_to_ptr.vmem [resolvable:$true] %s43_s24 }
  0x19   :  { %s1106_s1 = scalar_lea.vmem %s25_s22, 128  ;;  %p1111_p11 = scmp.lt.s32.totalorder %s25_s22, %s25_s22 }
  0x1a   :  { %p1107_p10 = scmp.ne.s32.totalorder %s25_s22, %s1106_s1  ;;  %p1112_p12 = scmp.lt.s32.totalorder %s1106_s1, %s1106_s1 }
  0x1c   :  { %p1113_p13 = por %p1112_p12, %p1111_p11 }
  0x1e   :  { %p1114_p0 = pnand %p1113_p13, %p1107_p10 }
  0x20   :  { %1117 = shalt.err (!%p1114_p0)
}
  0x21   :  { %27 = dma.hbm_to_vmem [thread:$0]  %s1287_s0, 128, %s25_s22, [#allocation4]  }
  0x22   :  { %s1126_s27 = scalar_lea.vmem %s44_s24, 2048  ;;  %p1131_p2 = scmp.lt.s32.totalorder %s44_s24, %s44_s24 }
  0x23   :  { %p1127_p1 = scmp.ne.s32.totalorder %s44_s24, %s1126_s27  ;;  %p1132_p3 = scmp.lt.s32.totalorder %s1126_s27, %s1126_s27 }
  0x25   :  { %p1133_p4 = por %p1132_p3, %p1131_p2 }
  0x27   :  { %p1134_p5 = pnand %p1133_p4, %p1127_p1 }
  0x29   :  { %1137 = shalt.err (!%p1134_p5)
}
  0x2a   :  { %s1170_s4 = smov 512   ;;  %s1171_s28 = smov 32  }
  0x2b   :  { %49 = dma.hbm_to_vmem [thread:$0]  %s1289_s2, 2048, %s44_s24, [#allocation6], %s1170_s4, %s1170_s4, %s1171_s28  }
  0x2c   :  { %s1172_s10 = smov [#allocation10]  }
  0x2d   :  { %s70_s11 = sshll.u32 %s1172_s10, 4  ;;  %s71_s11 = int_to_ptr.vmem [resolvable:$true] %s70_s11 }
  0x2e   :  { %s1146_s12 = scalar_lea.vmem %s71_s11, 384  ;;  %p1151_p7 = scmp.lt.s32.totalorder %s71_s11, %s71_s11 }
  0x2f   :  { %p1147_p6 = scmp.ne.s32.totalorder %s71_s11, %s1146_s12  ;;  %p1152_p8 = scmp.lt.s32.totalorder %s1146_s12, %s1146_s12 }
  0x31   :  { %p1153_p9 = por %p1152_p8, %p1151_p7 }
  0x33   :  { %p1154_p10 = pnand %p1153_p9, %p1147_p6 }
  0x35   :  { %1157 = shalt.err (!%p1154_p10)
}
  0x36   :  { %73 = dma.hbm_to_vmem [thread:$0]  %s1292_s5, 384, %s71_s11, [#allocation9]  }
  0x37   :  { %1158 = dma.done.wait [#allocation4], 128  }
  0x38   :  { %1159 = vsyncadd [#allocation4], 4294967168 }
  0x39   :  { %1160 = dma.done.wait [#allocation6], 2176  }
  0x3a   :  { %1161 = vsyncadd [#allocation6], 4294965120 }
  0x3b   :  { %1162 = dma.done.wait [#allocation9], 24960  }
  0x3c   :  { %1163 = vsyncadd [#allocation9], 4294942336  ;;  %v1173_v0 = vmov 0.0   ;;  %v109_v1 = vld [vmem:[#allocation7 + $0x68] sm:$0xff]  ;;  %v111_v2 = vld [vmem:[#allocation7 + $0x78] sm:$0xff]  ;;  %vm134_vm0 = vcmask 261120  }
  0x3d   :  { %202 = vmatprep.mubr.f32.mxu0 %v1173_v0  ;;  %273 = vmatprep.mubr.f32.mxu1 %v1173_v0  ;;  %v108_v3 = vld [vmem:[#allocation7 + $0x60] sm:$0xff]  ;;  %v110_v4 = vld [vmem:[#allocation7 + $0x70] sm:$0xff]  ;;  %v105_v5 = vld [vmem:[#allocation7 + $0x48] sm:$0xff]  ;;  %vm480_vm1 = vcmask 64512   ;;  %vm1174_vm2 = vmmov 0   ;;  %vm957_vm3 = vcmask 7168  }
  0x3e   :  { %162 = vmatprep.subr.mxu0 %v109_v1  ;;  %233 = vmatprep.subr.mxu1 %v111_v2  ;;  %v107_v6 = vld [vmem:[#allocation7 + $0x58] sm:$0xff]  ;;  %v104_v7 = vld [vmem:[#allocation7 + $0x40] sm:$0xff]  ;;  %v106_v8 = vld [vmem:[#allocation7 + $0x50] sm:$0xff] }
  0x3f   :  { %163 = vmatpush1.msra.mxu0 %v108_v3  ;;  %234 = vmatpush1.msra.mxu1 %v110_v4  ;;  %v101_v9 = vld [vmem:[#allocation7 + $0x28] sm:$0xff]  ;;  %v103_v10 = vld [vmem:[#allocation7 + $0x38] sm:$0xff]  ;;  %v100_v11 = vld [vmem:[#allocation7 + $0x20] sm:$0xff] }
  0x40   :  { %164 = vmatprep.subr.mxu0 %v105_v5  ;;  %235 = vmatprep.subr.mxu1 %v107_v6  ;;  %v102_v12 = vld [vmem:[#allocation7 + $0x30] sm:$0xff]  ;;  %v97_v13 = vld [vmem:[#allocation7 + $0x8] sm:$0xff]  ;;  %v99_v14 = vld [vmem:[#allocation7 + $0x18] sm:$0xff] }
  0x41   :  { %165 = vmatpush1.msra.mxu0 %v104_v7  ;;  %236 = vmatpush1.msra.mxu1 %v106_v8  ;;  %v96_v15 = vld [vmem:[#allocation7] sm:$0xff]  ;;  %v98_v16 = vld [vmem:[#allocation7 + $0x10] sm:$0xff]  ;;  %v478_v18 = vld [vmem:[#allocation10 + $0x8] sm:$0xff] }
  0x42   :  { %166 = vmatprep.subr.mxu0 %v101_v9  ;;  %237 = vmatprep.subr.mxu1 %v103_v10  ;;  %v95_v17 = vld [vmem:[#allocation3] sm:$0xff]  ;;  %v477_v19 = vld [vmem:[#allocation10] sm:$0xff]  ;;  %v476_v21 = vld [vmem:[#allocation5] sm:$0xff] }
  0x43   :  { %167 = vmatpush1.msra.mxu0 %v100_v11  ;;  %238 = vmatpush1.msra.mxu1 %v102_v12  ;;  %v479_v20 = vld [vmem:[#allocation10 + $0x10] sm:$0xff]  ;;  %v329_v24 = vld [vmem:[#allocation8 + $0x168] sm:$0xff]  ;;  %v327_v26 = vld [vmem:[#allocation8 + $0x158] sm:$0xff] }
  0x44   :  { %168 = vmatprep.subr.mxu0 %v97_v13  ;;  %239 = vmatprep.subr.mxu1 %v99_v14  ;;  %v330_v22 = vld [vmem:[#allocation8 + $0x170] sm:$0xff]  ;;  %v425_v25 = vld [vmem:[#allocation8 + $0x468] sm:$0xff]  ;;  %v423_v27 = vld [vmem:[#allocation8 + $0x458] sm:$0xff] }
  0x45   :  { %169 = vmatpush1.msra.mxu0 %v96_v15  ;;  %240 = vmatpush1.msra.mxu1 %v98_v16  ;;  %v426_v23 = vld [vmem:[#allocation8 + $0x470] sm:$0xff]  ;;  %v324_v30 = vld [vmem:[#allocation8 + $0x140] sm:$0xff]  ;;  %v323_v32 = vld [vmem:[#allocation8 + $0x138] sm:$0xff] }
  0x46   :  { %966 = vmatmul.mubr.msk.f32.vlgmr.msra.gmra.mxu0 %vm134_vm0, %v95_v17  ;;  %967 = vmatmul.mubr.msk.f32.vlgmr.msra.gmra.mxu1 %vm134_vm0, %v95_v17  ;;  %v326_v28 = vld [vmem:[#allocation8 + $0x150] sm:$0xff]  ;;  %v420_v31 = vld [vmem:[#allocation8 + $0x440] sm:$0xff]  ;;  %v419_v33 = vld [vmem:[#allocation8 + $0x438] sm:$0xff] }
  0x47   :  { %514 = vmatprep.subr.mxu0 %v478_v18  ;;  %548 = vmatprep.mubr.f32.mxu0 %v1173_v0  ;;  %v422_v29 = vld [vmem:[#allocation8 + $0x450] sm:$0xff]  ;;  %v321_v34 = vld [vmem:[#allocation8 + $0x128] sm:$0xff]  ;;  %v320_v36 = vld [vmem:[#allocation8 + $0x120] sm:$0xff] }
  0x48   :  { %515 = vmatpush1.msra.mxu0 %v477_v19  ;;  %1042 = vmatprep.subr.mxu1 %v1173_v0  ;;  %v417_v35 = vld [vmem:[#allocation8 + $0x428] sm:$0xff]  ;;  %v416_v37 = vld [vmem:[#allocation8 + $0x420] sm:$0xff]  ;;  %v318_v38 = vld [vmem:[#allocation8 + $0x110] sm:$0xff] }
  0x49   :  { %1043 = vmatpush3.msra.mxu1 %v479_v20  ;;  %1044 = vmatprep.mubr.msk.f32.mxu1 %vm1174_vm2, %v1173_v0  ;;  %v414_v39 = vld [vmem:[#allocation8 + $0x410] sm:$0xff]  ;;  %v317_v40 = vld [vmem:[#allocation8 + $0x108] sm:$0xff]  ;;  %v315_v42 = vld [vmem:[#allocation8 + $0xf8] sm:$0xff] }
  0x4a   :  { %968 = vmatmul.mubr.msk.f32.vlgmr.msra.gmra.mxu0 %vm480_vm1, %v476_v21  ;;  %625 = vmatprep.subr.mxu0 %v330_v22  ;;  %v413_v41 = vld [vmem:[#allocation8 + $0x408] sm:$0xff]  ;;  %v411_v43 = vld [vmem:[#allocation8 + $0x3f8] sm:$0xff]  ;;  %v314_v44 = vld [vmem:[#allocation8 + $0xf0] sm:$0xff] }
  0x4b   :  { %696 = vmatprep.subr.mxu1 %v426_v23  ;;  %1045 = vmatmul.mubr.msk.f32.vlgmr.msra.gmra.mxu1 %vm480_vm1, %v476_v21  ;;  %v410_v45 = vld [vmem:[#allocation8 + $0x3f0] sm:$0xff]  ;;  %v312_v46 = vld [vmem:[#allocation8 + $0xe0] sm:$0xff]  ;;  %v311_v48 = vld [vmem:[#allocation8 + $0xd8] sm:$0xff] }
  0x4c   :  { %626 = vmatpush1.msra.mxu0 %v329_v24  ;;  %697 = vmatpush1.msra.mxu1 %v425_v25  ;;  %v408_v47 = vld [vmem:[#allocation8 + $0x3e0] sm:$0xff]  ;;  %v407_v49 = vld [vmem:[#allocation8 + $0x3d8] sm:$0xff]  ;;  %v309_v50 = vld [vmem:[#allocation8 + $0xc8] sm:$0xff] }
  0x4d   :  { %627 = vmatprep.subr.mxu0 %v327_v26  ;;  %698 = vmatprep.subr.mxu1 %v423_v27  ;;  %v405_v51 = vld [vmem:[#allocation8 + $0x3c8] sm:$0xff]  ;;  %v308_v52 = vld [vmem:[#allocation8 + $0xc0] sm:$0xff]  ;;  %v306_v54 = vld [vmem:[#allocation8 + $0xb0] sm:$0xff] }
  0x4e   :  { %628 = vmatpush1.msra.mxu0 %v326_v28  ;;  %699 = vmatpush1.msra.mxu1 %v422_v29  ;;  %v404_v53 = vld [vmem:[#allocation8 + $0x3c0] sm:$0xff]  ;;  %v402_v55 = vld [vmem:[#allocation8 + $0x3b0] sm:$0xff]  ;;  %v305_v56 = vld [vmem:[#allocation8 + $0xa8] sm:$0xff] }
  0x4f   :  { %629 = vmatprep.subr.mxu0 %v324_v30  ;;  %700 = vmatprep.subr.mxu1 %v420_v31  ;;  %v401_v57 = vld [vmem:[#allocation8 + $0x3a8] sm:$0xff]  ;;  %v303_v58 = vld [vmem:[#allocation8 + $0x98] sm:$0xff]  ;;  %v302_v60 = vld [vmem:[#allocation8 + $0x90] sm:$0xff] }
  0x50   :  { %630 = vmatpush1.msra.mxu0 %v323_v32  ;;  %701 = vmatpush1.msra.mxu1 %v419_v33  ;;  %v399_v59 = vld [vmem:[#allocation8 + $0x398] sm:$0xff]  ;;  %v398_v61 = vld [vmem:[#allocation8 + $0x390] sm:$0xff]  ;;  %v300_v62 = vld [vmem:[#allocation8 + $0x80] sm:$0xff] }
  0x51   :  { %631 = vmatprep.subr.mxu0 %v321_v34  ;;  %702 = vmatprep.subr.mxu1 %v417_v35  ;;  %v396_v63 = vld [vmem:[#allocation8 + $0x380] sm:$0xff]  ;;  %v299_v0 = vld [vmem:[#allocation8 + $0x78] sm:$0xff]  ;;  %v297_v2 = vld [vmem:[#allocation8 + $0x68] sm:$0xff] }
  0x52   :  { %632 = vmatpush1.msra.mxu0 %v320_v36  ;;  %703 = vmatpush1.msra.mxu1 %v416_v37  ;;  %v395_v1 = vld [vmem:[#allocation8 + $0x378] sm:$0xff]  ;;  %v393_v3 = vld [vmem:[#allocation8 + $0x368] sm:$0xff]  ;;  %v296_v4 = vld [vmem:[#allocation8 + $0x60] sm:$0xff] }
  0x53   :  { %633 = vmatprep.subr.mxu0 %v318_v38  ;;  %704 = vmatprep.subr.mxu1 %v414_v39  ;;  %v392_v5 = vld [vmem:[#allocation8 + $0x360] sm:$0xff]  ;;  %v294_v6 = vld [vmem:[#allocation8 + $0x50] sm:$0xff]  ;;  %v293_v8 = vld [vmem:[#allocation8 + $0x48] sm:$0xff] }
  0x54   :  { %634 = vmatpush1.msra.mxu0 %v317_v40  ;;  %705 = vmatpush1.msra.mxu1 %v413_v41  ;;  %v390_v7 = vld [vmem:[#allocation8 + $0x350] sm:$0xff]  ;;  %v389_v9 = vld [vmem:[#allocation8 + $0x348] sm:$0xff]  ;;  %v291_v10 = vld [vmem:[#allocation8 + $0x38] sm:$0xff] }
  0x55   :  { %635 = vmatprep.subr.mxu0 %v315_v42  ;;  %706 = vmatprep.subr.mxu1 %v411_v43  ;;  %v387_v11 = vld [vmem:[#allocation8 + $0x338] sm:$0xff]  ;;  %v290_v12 = vld [vmem:[#allocation8 + $0x30] sm:$0xff]  ;;  %v288_v14 = vld [vmem:[#allocation8 + $0x20] sm:$0xff] }
  0x56   :  { %636 = vmatpush1.msra.mxu0 %v314_v44  ;;  %707 = vmatpush1.msra.mxu1 %v410_v45  ;;  %v386_v13 = vld [vmem:[#allocation8 + $0x330] sm:$0xff]  ;;  %v384_v15 = vld [vmem:[#allocation8 + $0x320] sm:$0xff]  ;;  %v287_v16 = vld [vmem:[#allocation8 + $0x18] sm:$0xff] }
  0x57   :  { %637 = vmatprep.subr.mxu0 %v312_v46  ;;  %708 = vmatprep.subr.mxu1 %v408_v47  ;;  %v383_v17 = vld [vmem:[#allocation8 + $0x318] sm:$0xff]  ;;  %v285_v18 = vld [vmem:[#allocation8 + $0x8] sm:$0xff]  ;;  %v284_v20 = vld [vmem:[#allocation8] sm:$0xff] }
  0x58   :  { %638 = vmatpush1.msra.mxu0 %v311_v48  ;;  %709 = vmatpush1.msra.mxu1 %v407_v49  ;;  %v381_v19 = vld [vmem:[#allocation8 + $0x308] sm:$0xff]  ;;  %v380_v21 = vld [vmem:[#allocation8 + $0x300] sm:$0xff]  ;;  %v378_v22 = vld [vmem:[#allocation8 + $0x2f0] sm:$0xff] }
  0x59   :  { %639 = vmatprep.subr.mxu0 %v309_v50  ;;  %710 = vmatprep.subr.mxu1 %v405_v51  ;;  %v474_v23 = vld [vmem:[#allocation8 + $0x5f0] sm:$0xff]  ;;  %v377_v24 = vld [vmem:[#allocation8 + $0x2e8] sm:$0xff]  ;;  %v375_v26 = vld [vmem:[#allocation8 + $0x2d8] sm:$0xff] }
  0x5a   :  { %640 = vmatpush1.msra.mxu0 %v308_v52  ;;  %711 = vmatpush1.msra.mxu1 %v404_v53  ;;  %v473_v25 = vld [vmem:[#allocation8 + $0x5e8] sm:$0xff]  ;;  %v471_v27 = vld [vmem:[#allocation8 + $0x5d8] sm:$0xff]  ;;  %v374_v28 = vld [vmem:[#allocation8 + $0x2d0] sm:$0xff] }
  0x5b   :  { %641 = vmatprep.subr.mxu0 %v306_v54  ;;  %712 = vmatprep.subr.mxu1 %v402_v55  ;;  %v470_v29 = vld [vmem:[#allocation8 + $0x5d0] sm:$0xff]  ;;  %v372_v30 = vld [vmem:[#allocation8 + $0x2c0] sm:$0xff]  ;;  %v371_v32 = vld [vmem:[#allocation8 + $0x2b8] sm:$0xff] }
  0x5c   :  { %642 = vmatpush1.msra.mxu0 %v305_v56  ;;  %713 = vmatpush1.msra.mxu1 %v401_v57  ;;  %v468_v31 = vld [vmem:[#allocation8 + $0x5c0] sm:$0xff]  ;;  %v467_v33 = vld [vmem:[#allocation8 + $0x5b8] sm:$0xff]  ;;  %v369_v34 = vld [vmem:[#allocation8 + $0x2a8] sm:$0xff] }
  0x5d   :  { %643 = vmatprep.subr.mxu0 %v303_v58  ;;  %714 = vmatprep.subr.mxu1 %v399_v59  ;;  %v465_v35 = vld [vmem:[#allocation8 + $0x5a8] sm:$0xff]  ;;  %v368_v36 = vld [vmem:[#allocation8 + $0x2a0] sm:$0xff]  ;;  %v366_v38 = vld [vmem:[#allocation8 + $0x290] sm:$0xff] }
  0x5e   :  { %644 = vmatpush1.msra.mxu0 %v302_v60  ;;  %715 = vmatpush1.msra.mxu1 %v398_v61  ;;  %v464_v37 = vld [vmem:[#allocation8 + $0x5a0] sm:$0xff]  ;;  %v462_v39 = vld [vmem:[#allocation8 + $0x590] sm:$0xff]  ;;  %v365_v40 = vld [vmem:[#allocation8 + $0x288] sm:$0xff] }
  0x5f   :  { %645 = vmatprep.subr.mxu0 %v300_v62  ;;  %716 = vmatprep.subr.mxu1 %v396_v63  ;;  %v461_v41 = vld [vmem:[#allocation8 + $0x588] sm:$0xff]  ;;  %v363_v42 = vld [vmem:[#allocation8 + $0x278] sm:$0xff]  ;;  %v362_v44 = vld [vmem:[#allocation8 + $0x270] sm:$0xff] }
  0x60   :  { %646 = vmatpush1.msra.mxu0 %v299_v0  ;;  %717 = vmatpush1.msra.mxu1 %v395_v1  ;;  %v459_v43 = vld [vmem:[#allocation8 + $0x578] sm:$0xff]  ;;  %v458_v45 = vld [vmem:[#allocation8 + $0x570] sm:$0xff]  ;;  %v360_v46 = vld [vmem:[#allocation8 + $0x260] sm:$0xff] }
  0x61   :  { %647 = vmatprep.subr.mxu0 %v297_v2  ;;  %718 = vmatprep.subr.mxu1 %v393_v3  ;;  %v456_v47 = vld [vmem:[#allocation8 + $0x560] sm:$0xff]  ;;  %v359_v48 = vld [vmem:[#allocation8 + $0x258] sm:$0xff]  ;;  %v357_v50 = vld [vmem:[#allocation8 + $0x248] sm:$0xff] }
  0x62   :  { %648 = vmatpush1.msra.mxu0 %v296_v4  ;;  %719 = vmatpush1.msra.mxu1 %v392_v5  ;;  %v455_v49 = vld [vmem:[#allocation8 + $0x558] sm:$0xff]  ;;  %v453_v51 = vld [vmem:[#allocation8 + $0x548] sm:$0xff]  ;;  %v356_v52 = vld [vmem:[#allocation8 + $0x240] sm:$0xff] }
  0x63   :  { %649 = vmatprep.subr.mxu0 %v294_v6  ;;  %720 = vmatprep.subr.mxu1 %v390_v7  ;;  %v452_v53 = vld [vmem:[#allocation8 + $0x540] sm:$0xff]  ;;  %v354_v54 = vld [vmem:[#allocation8 + $0x230] sm:$0xff]  ;;  %v353_v56 = vld [vmem:[#allocation8 + $0x228] sm:$0xff] }
  0x64   :  { %650 = vmatpush1.msra.mxu0 %v293_v8  ;;  %721 = vmatpush1.msra.mxu1 %v389_v9  ;;  %v450_v55 = vld [vmem:[#allocation8 + $0x530] sm:$0xff]  ;;  %v449_v57 = vld [vmem:[#allocation8 + $0x528] sm:$0xff]  ;;  %v351_v58 = vld [vmem:[#allocation8 + $0x218] sm:$0xff] }
  0x65   :  { %651 = vmatprep.subr.mxu0 %v291_v10  ;;  %722 = vmatprep.subr.mxu1 %v387_v11  ;;  %v447_v59 = vld [vmem:[#allocation8 + $0x518] sm:$0xff]  ;;  %v350_v60 = vld [vmem:[#allocation8 + $0x210] sm:$0xff]  ;;  %v348_v62 = vld [vmem:[#allocation8 + $0x200] sm:$0xff] }
  0x66   :  { %652 = vmatpush1.msra.mxu0 %v290_v12  ;;  %723 = vmatpush1.msra.mxu1 %v386_v13  ;;  %v446_v61 = vld [vmem:[#allocation8 + $0x510] sm:$0xff]  ;;  %v444_v63 = vld [vmem:[#allocation8 + $0x500] sm:$0xff]  ;;  %v347_v0 = vld [vmem:[#allocation8 + $0x1f8] sm:$0xff] }
  0x67   :  { %653 = vmatprep.subr.mxu0 %v288_v14  ;;  %724 = vmatprep.subr.mxu1 %v384_v15  ;;  %v443_v1 = vld [vmem:[#allocation8 + $0x4f8] sm:$0xff]  ;;  %v345_v2 = vld [vmem:[#allocation8 + $0x1e8] sm:$0xff]  ;;  %v344_v4 = vld [vmem:[#allocation8 + $0x1e0] sm:$0xff] }
  0x68   :  { %654 = vmatpush1.msra.mxu0 %v287_v16  ;;  %725 = vmatpush1.msra.mxu1 %v383_v17  ;;  %v441_v3 = vld [vmem:[#allocation8 + $0x4e8] sm:$0xff]  ;;  %v440_v5 = vld [vmem:[#allocation8 + $0x4e0] sm:$0xff]  ;;  %v342_v6 = vld [vmem:[#allocation8 + $0x1d0] sm:$0xff] }
  0x69   :  { %655 = vmatprep.subr.mxu0 %v285_v18  ;;  %726 = vmatprep.subr.mxu1 %v381_v19  ;;  %v438_v7 = vld [vmem:[#allocation8 + $0x4d0] sm:$0xff]  ;;  %v341_v8 = vld [vmem:[#allocation8 + $0x1c8] sm:$0xff]  ;;  %v339_v10 = vld [vmem:[#allocation8 + $0x1b8] sm:$0xff] }
  0x6a   :  { %656 = vmatpush1.msra.mxu0 %v284_v20  ;;  %727 = vmatpush1.msra.mxu1 %v380_v21  ;;  %v437_v9 = vld [vmem:[#allocation8 + $0x4c8] sm:$0xff]  ;;  %v435_v11 = vld [vmem:[#allocation8 + $0x4b8] sm:$0xff]  ;;  %v338_v12 = vld [vmem:[#allocation8 + $0x1b0] sm:$0xff] }
  0x6b   :  { %657 = vmatprep.subr.mxu0 %v378_v22  ;;  %728 = vmatprep.subr.mxu1 %v474_v23  ;;  %v434_v13 = vld [vmem:[#allocation8 + $0x4b0] sm:$0xff]  ;;  %v336_v14 = vld [vmem:[#allocation8 + $0x1a0] sm:$0xff]  ;;  %v335_v16 = vld [vmem:[#allocation8 + $0x198] sm:$0xff] }
  0x6c   :  { %658 = vmatpush2.msra.mxu0 %v377_v24  ;;  %729 = vmatpush2.msra.mxu1 %v473_v25  ;;  %v432_v15 = vld [vmem:[#allocation8 + $0x4a0] sm:$0xff]  ;;  %v431_v17 = vld [vmem:[#allocation8 + $0x498] sm:$0xff]  ;;  %v333_v18 = vld [vmem:[#allocation8 + $0x188] sm:$0xff]  ;;  %v114_v24 = vlaneseq }
  0x6d   :  { %659 = vmatprep.subr.mxu0 %v375_v26  ;;  %730 = vmatprep.subr.mxu1 %v471_v27  ;;  %v429_v19 = vld [vmem:[#allocation8 + $0x488] sm:$0xff]  ;;  %v332_v20 = vld [vmem:[#allocation8 + $0x180] sm:$0xff]  ;;  %v379_v22 = vld [vmem:[#allocation8 + $0x2f8] sm:$0xff] }
  0x6e   :  { %660 = vmatpush2.msra.mxu0 %v374_v28  ;;  %731 = vmatpush2.msra.mxu1 %v470_v29  ;;  %v428_v21 = vld [vmem:[#allocation8 + $0x480] sm:$0xff]  ;;  %v475_v23 = vld [vmem:[#allocation8 + $0x5f8] sm:$0xff]  ;;  %v115_v25 = vshrl.u32 %v114_v24, 7  ;;  %v112_v28 = vld [vmem:[%s1290_s3] sm:$0xf] }
  0x6f   :  { %661 = vmatprep.subr.mxu0 %v372_v30  ;;  %732 = vmatprep.subr.mxu1 %v468_v31  ;;  %v445_v24 = vld [vmem:[#allocation8 + $0x508] sm:$0xff] }
  0x70   :  { %662 = vmatpush2.msra.mxu0 %v371_v32  ;;  %733 = vmatpush2.msra.mxu1 %v467_v33  ;;  %v1240_v26 = vsub.s32 2, %v115_v25  ;;  %v1242_v27 = vsub.s32 0, %v115_v25  ;;  %v1247_v29 = vsub.s32 1, %v115_v25  ;;  %v128_v30 = vsub.s32 3, %v115_v25  ;;  %v301_v25 = vld [vmem:[#allocation8 + $0x88] sm:$0xff] }
  0x71   :  { %663 = vmatprep.subr.mxu0 %v369_v34  ;;  %734 = vmatprep.subr.mxu1 %v465_v35 }
  0x72   :  { %664 = vmatpush2.msra.mxu0 %v368_v36  ;;  %735 = vmatpush2.msra.mxu1 %v464_v37  ;;  %v125_v31 = vrot.slane %v112_v28, %v1240_v26  ;;  %v117_v32 = vrot.slane %v112_v28, %v1242_v27  ;;  %v121_v33 = vrot.slane %v112_v28, %v1247_v29 }
  0x73   :  { %665 = vmatprep.subr.mxu0 %v366_v38  ;;  %736 = vmatprep.subr.mxu1 %v462_v39  ;;  %v129_v34 = vrot.slane %v112_v28, %v128_v30  ;;  %v397_v28 = vld [vmem:[#allocation8 + $0x388] sm:$0xff]  ;;  %v346_v30 = vld [vmem:[#allocation8 + $0x1f0] sm:$0xff] }
  0x74   :  { %666 = vmatpush2.msra.mxu0 %v365_v40  ;;  %737 = vmatpush2.msra.mxu1 %v461_v41 }
  0x75   :  { %667 = vmatprep.subr.mxu0 %v363_v42  ;;  %738 = vmatprep.subr.mxu1 %v459_v43 }
  0x76   :  { %668 = vmatpush2.msra.mxu0 %v362_v44  ;;  %739 = vmatpush2.msra.mxu1 %v458_v45 }
  0x77   :  { %669 = vmatprep.subr.mxu0 %v360_v46  ;;  %740 = vmatprep.subr.mxu1 %v456_v47 }
  0x78   :  { %670 = vmatpush2.msra.mxu0 %v359_v48  ;;  %741 = vmatpush2.msra.mxu1 %v455_v49  ;;  %v331_v48 = vld [vmem:[#allocation8 + $0x178] sm:$0xff] }
  0x79   :  { %671 = vmatprep.subr.mxu0 %v357_v50  ;;  %742 = vmatprep.subr.mxu1 %v453_v51  ;;  %v427_v49 = vld [vmem:[#allocation8 + $0x478] sm:$0xff]  ;;  %v376_v50 = vld [vmem:[#allocation8 + $0x2e0] sm:$0xff] }
  0x7a   :  { %672 = vmatpush2.msra.mxu0 %v356_v52  ;;  %743 = vmatpush2.msra.mxu1 %v452_v53  ;;  %v472_v52 = vld [vmem:[#allocation8 + $0x5e0] sm:$0xff] }
  0x7b   :  { %673 = vmatprep.subr.mxu0 %v354_v54  ;;  %744 = vmatprep.subr.mxu1 %v450_v55  ;;  %v328_v53 = vld [vmem:[#allocation8 + $0x160] sm:$0xff]  ;;  %v373_v55 = vld [vmem:[#allocation8 + $0x2c8] sm:$0xff] }
  0x7c   :  { %674 = vmatpush2.msra.mxu0 %v353_v56  ;;  %745 = vmatpush2.msra.mxu1 %v449_v57  ;;  %v424_v54 = vld [vmem:[#allocation8 + $0x460] sm:$0xff]  ;;  %v469_v56 = vld [vmem:[#allocation8 + $0x5c8] sm:$0xff] }
  0x7d   :  { %675 = vmatprep.subr.mxu0 %v351_v58  ;;  %746 = vmatprep.subr.mxu1 %v447_v59  ;;  %v325_v57 = vld [vmem:[#allocation8 + $0x148] sm:$0xff]  ;;  %v370_v59 = vld [vmem:[#allocation8 + $0x2b0] sm:$0xff] }
  0x7e   :  { %676 = vmatpush2.msra.mxu0 %v350_v60  ;;  %747 = vmatpush2.msra.mxu1 %v446_v61  ;;  %v421_v58 = vld [vmem:[#allocation8 + $0x448] sm:$0xff]  ;;  %v466_v60 = vld [vmem:[#allocation8 + $0x5b0] sm:$0xff] }
  0x7f   :  { %677 = vmatprep.subr.mxu0 %v348_v62  ;;  %748 = vmatprep.subr.mxu1 %v444_v63  ;;  %v322_v61 = vld [vmem:[#allocation8 + $0x130] sm:$0xff]  ;;  %v367_v63 = vld [vmem:[#allocation8 + $0x298] sm:$0xff] }
  0x80   :  { %678 = vmatpush2.msra.mxu0 %v347_v0  ;;  %749 = vmatpush2.msra.mxu1 %v443_v1  ;;  %v418_v62 = vld [vmem:[#allocation8 + $0x430] sm:$0xff]  ;;  %v463_v0 = vld [vmem:[#allocation8 + $0x598] sm:$0xff] }
  0x81   :  { %679 = vmatprep.subr.mxu0 %v345_v2  ;;  %750 = vmatprep.subr.mxu1 %v441_v3  ;;  %v319_v1 = vld [vmem:[#allocation8 + $0x118] sm:$0xff]  ;;  %v364_v3 = vld [vmem:[#allocation8 + $0x280] sm:$0xff] }
  0x82   :  { %680 = vmatpush2.msra.mxu0 %v344_v4  ;;  %751 = vmatpush2.msra.mxu1 %v440_v5  ;;  %v415_v2 = vld [vmem:[#allocation8 + $0x418] sm:$0xff]  ;;  %v460_v4 = vld [vmem:[#allocation8 + $0x580] sm:$0xff] }
  0x83   :  { %681 = vmatprep.subr.mxu0 %v342_v6  ;;  %752 = vmatprep.subr.mxu1 %v438_v7  ;;  %v316_v5 = vld [vmem:[#allocation8 + $0x100] sm:$0xff]  ;;  %v361_v7 = vld [vmem:[#allocation8 + $0x268] sm:$0xff] }
  0x84   :  { %682 = vmatpush2.msra.mxu0 %v341_v8  ;;  %753 = vmatpush2.msra.mxu1 %v437_v9  ;;  %v412_v6 = vld [vmem:[#allocation8 + $0x400] sm:$0xff]  ;;  %v457_v8 = vld [vmem:[#allocation8 + $0x568] sm:$0xff] }
  0x85   :  { %683 = vmatprep.subr.mxu0 %v339_v10  ;;  %754 = vmatprep.subr.mxu1 %v435_v11  ;;  %v313_v9 = vld [vmem:[#allocation8 + $0xe8] sm:$0xff]  ;;  %v358_v11 = vld [vmem:[#allocation8 + $0x250] sm:$0xff] }
  0x86   :  { %684 = vmatpush2.msra.mxu0 %v338_v12  ;;  %755 = vmatpush2.msra.mxu1 %v434_v13  ;;  %v409_v10 = vld [vmem:[#allocation8 + $0x3e8] sm:$0xff]  ;;  %v454_v12 = vld [vmem:[#allocation8 + $0x550] sm:$0xff] }
  0x87   :  { %685 = vmatprep.subr.mxu0 %v336_v14  ;;  %756 = vmatprep.subr.mxu1 %v432_v15  ;;  %v310_v13 = vld [vmem:[#allocation8 + $0xd0] sm:$0xff]  ;;  %v355_v15 = vld [vmem:[#allocation8 + $0x238] sm:$0xff] }
  0x88   :  { %686 = vmatpush2.msra.mxu0 %v335_v16  ;;  %757 = vmatpush2.msra.mxu1 %v431_v17  ;;  %v406_v14 = vld [vmem:[#allocation8 + $0x3d0] sm:$0xff]  ;;  %v451_v16 = vld [vmem:[#allocation8 + $0x538] sm:$0xff] }
  0x89   :  { %687 = vmatprep.subr.mxu0 %v333_v18  ;;  %758 = vmatprep.subr.mxu1 %v429_v19  ;;  %v307_v17 = vld [vmem:[#allocation8 + $0xb8] sm:$0xff]  ;;  %v352_v19 = vld [vmem:[#allocation8 + $0x220] sm:$0xff] }
  0x8a   :  { %688 = vmatpush2.msra.mxu0 %v332_v20  ;;  %759 = vmatpush2.msra.mxu1 %v428_v21  ;;  %v403_v18 = vld [vmem:[#allocation8 + $0x3b8] sm:$0xff]  ;;  %v448_v20 = vld [vmem:[#allocation8 + $0x520] sm:$0xff] }
  0x8b   :  { %972 = vmatprep.subr.mxu0 %v379_v22  ;;  %1007 = vmatprep.subr.mxu1 %v475_v23  ;;  %v304_v21 = vld [vmem:[#allocation8 + $0xa0] sm:$0xff]  ;;  %v349_v23 = vld [vmem:[#allocation8 + $0x208] sm:$0xff] }
  0x8c   :  { %v400_v22 = vld [vmem:[#allocation8 + $0x3a0] sm:$0xff] }
 0x106   :  { %v204_v35 = vpop.f32.mrf.mxu0  ;;  %v275_v36 = vpop.f32.mrf.mxu1 }
 0x107   :  { %v1252_v37 = vadd.f32 %v275_v36, %v125_v31  ;;  %v1254_v38 = vadd.f32 %v204_v35, %v117_v32  ;;  %v442_v31 = vld [vmem:[#allocation8 + $0x4f0] sm:$0xff]  ;;  %v439_v35 = vld [vmem:[#allocation8 + $0x4d8] sm:$0xff] }
 0x108   :  { %v206_v39 = vpop.f32.mrf.mxu0  ;;  %v277_v40 = vpop.f32.mrf.mxu1  ;;  %v298_v32 = vld [vmem:[#allocation8 + $0x70] sm:$0xff]  ;;  %v295_v36 = vld [vmem:[#allocation8 + $0x58] sm:$0xff] }
 0x109   :  { %v207_v41 = vadd.f32 %v206_v39, %v121_v33  ;;  %v278_v42 = vadd.f32 %v277_v40, %v129_v34  ;;  %v282_v43 = vmax.f32 %v1252_v37, 0.0  ;;  %v280_v47 = vmax.f32 %v1254_v38, 0.0  ;;  %v394_v33 = vld [vmem:[#allocation8 + $0x370] sm:$0xff]  ;;  %v343_v34 = vld [vmem:[#allocation8 + $0x1d8] sm:$0xff]  ;;  %v340_v40 = vld [vmem:[#allocation8 + $0x1c0] sm:$0xff] }
 0x10a   :  { %v391_v39 = vld [vmem:[#allocation8 + $0x358] sm:$0xff] }
 0x10b   :  { %v281_v44 = vmax.f32 %v207_v41, 0.0  ;;  %v283_v45 = vmax.f32 %v278_v42, 0.0  ;;  %v1257_v46 = vpop.f32.mrf.mxu1  ;;  %v436_v41 = vld [vmem:[#allocation8 + $0x4c0] sm:$0xff] }
 0x10c   :  { %v292_v42 = vld [vmem:[#allocation8 + $0x40] sm:$0xff] }
 0x10d   :  { %689 = vmatprep.mubr.f32.mxu0 %v281_v44  ;;  %760 = vmatprep.mubr.f32.mxu1 %v283_v45  ;;  %v1046_v51 = vpop.f32.mrf.mxu1 }
 0x10e   :  { %690 = vmatmul.mubr.f32.vlgmr.msra.gmra.mxu0 %v280_v47  ;;  %761 = vmatmul.mubr.f32.vlgmr.msra.gmra.mxu1 %v282_v43  ;;  %v334_v51 = vld [vmem:[#allocation8 + $0x190] sm:$0xff] }
 0x10f   :  { %973 = vmatpush3.msra.mxu0 %v331_v48  ;;  %1008 = vmatpush3.msra.mxu1 %v427_v49  ;;  %v433_v48 = vld [vmem:[#allocation8 + $0x4a8] sm:$0xff] }
 0x110   :  { %974 = vmatprep.subr.mxu0 %v376_v50  ;;  %831 = vmatprep.mubr.f32.mxu0 %v281_v44  ;;  %v388_v44 = vld [vmem:[#allocation8 + $0x340] sm:$0xff]  ;;  %v289_v49 = vld [vmem:[#allocation8 + $0x28] sm:$0xff] }
 0x111   :  { %1009 = vmatprep.subr.mxu1 %v472_v52  ;;  %901 = vmatprep.mubr.f32.mxu1 %v283_v45  ;;  %v337_v45 = vld [vmem:[#allocation8 + $0x1a8] sm:$0xff]  ;;  %v430_v52 = vld [vmem:[#allocation8 + $0x490] sm:$0xff] }
 0x112   :  { %975 = vmatpush3.msra.mxu0 %v328_v53  ;;  %1010 = vmatpush3.msra.mxu1 %v424_v54  ;;  %v385_v50 = vld [vmem:[#allocation8 + $0x328] sm:$0xff]  ;;  %v286_v53 = vld [vmem:[#allocation8 + $0x10] sm:$0xff] }
 0x113   :  { %976 = vmatprep.subr.mxu0 %v373_v55  ;;  %1011 = vmatprep.subr.mxu1 %v469_v56  ;;  %v382_v54 = vld [vmem:[#allocation8 + $0x310] sm:$0xff]  ;;  %v550_v55 = vpop.f32.mrf.mxu0 }
 0x114   :  { %977 = vmatpush3.msra.mxu0 %v325_v57  ;;  %1012 = vmatpush3.msra.mxu1 %v421_v58 }
 0x115   :  { %978 = vmatprep.subr.mxu0 %v370_v59  ;;  %1013 = vmatprep.subr.mxu1 %v466_v60  ;;  %v552_v56 = vpop.f32.mrf.mxu0 }
 0x116   :  { %979 = vmatpush3.msra.mxu0 %v322_v61  ;;  %1014 = vmatpush3.msra.mxu1 %v418_v62  ;;  %v907_v62 = vld [vmem:[%s1293_s6] sm:$0x7] }
 0x117   :  { %980 = vmatprep.subr.mxu0 %v367_v63  ;;  %1015 = vmatprep.subr.mxu1 %v463_v0 }
 0x118   :  { %981 = vmatpush3.msra.mxu0 %v319_v1  ;;  %1016 = vmatpush3.msra.mxu1 %v415_v2  ;;  %v916_v1 = vrot.slane %v907_v62, %v1247_v29 }
 0x119   :  { %982 = vmatprep.subr.mxu0 %v364_v3  ;;  %1017 = vmatprep.subr.mxu1 %v460_v4 }
 0x11a   :  { %983 = vmatpush3.msra.mxu0 %v316_v5  ;;  %1018 = vmatpush3.msra.mxu1 %v412_v6 }
 0x11b   :  { %984 = vmatprep.subr.mxu0 %v361_v7  ;;  %1019 = vmatprep.subr.mxu1 %v457_v8  ;;  %v930_v7 = vld [vmem:[%s1294_s7] sm:$0x7] }
 0x11c   :  { %985 = vmatpush3.msra.mxu0 %v313_v9  ;;  %1020 = vmatpush3.msra.mxu1 %v409_v10  ;;  %v939_v8 = vrot.slane %v930_v7, %v1247_v29  ;;  %v955_v29 = vstv %s1295_s8 }
 0x11d   :  { %986 = vmatprep.subr.mxu0 %v358_v11  ;;  %1021 = vmatprep.subr.mxu1 %v454_v12  ;;  %v920_v12 = vrot.slane %v907_v62, %v1240_v26 }
 0x11e   :  { %987 = vmatpush3.msra.mxu0 %v310_v13  ;;  %1022 = vmatpush3.msra.mxu1 %v406_v14 }
 0x11f   :  { %988 = vmatprep.subr.mxu0 %v355_v15  ;;  %1023 = vmatprep.subr.mxu1 %v451_v16  ;;  %v935_v15 = vrot.slane %v930_v7, %v1242_v27 }
 0x120   :  { %989 = vmatpush3.msra.mxu0 %v307_v17  ;;  %1024 = vmatpush3.msra.mxu1 %v403_v18  ;;  %v943_v17 = vrot.slane %v930_v7, %v1240_v26 }
 0x121   :  { %990 = vmatprep.subr.mxu0 %v352_v19  ;;  %1025 = vmatprep.subr.mxu1 %v448_v20 }
 0x122   :  { %991 = vmatpush3.msra.mxu0 %v304_v21  ;;  %1026 = vmatpush3.msra.mxu1 %v400_v22 }
 0x123   :  { %992 = vmatprep.subr.mxu0 %v349_v23  ;;  %1027 = vmatprep.subr.mxu1 %v445_v24 }
 0x124   :  { %993 = vmatpush3.msra.mxu0 %v301_v25  ;;  %1028 = vmatpush3.msra.mxu1 %v397_v28 }
 0x125   :  { %994 = vmatprep.subr.mxu0 %v346_v30  ;;  %1029 = vmatprep.subr.mxu1 %v442_v31 }
 0x126   :  { %995 = vmatpush3.msra.mxu0 %v298_v32  ;;  %1030 = vmatpush3.msra.mxu1 %v394_v33 }
 0x127   :  { %996 = vmatprep.subr.mxu0 %v343_v34  ;;  %1031 = vmatprep.subr.mxu1 %v439_v35 }
 0x128   :  { %997 = vmatpush3.msra.mxu0 %v295_v36  ;;  %1032 = vmatpush3.msra.mxu1 %v391_v39 }
 0x129   :  { %998 = vmatprep.subr.mxu0 %v340_v40  ;;  %1033 = vmatprep.subr.mxu1 %v436_v41 }
 0x12a   :  { %999 = vmatpush3.msra.mxu0 %v292_v42  ;;  %1034 = vmatpush3.msra.mxu1 %v388_v44 }
 0x12b   :  { %1000 = vmatprep.subr.mxu0 %v337_v45  ;;  %1035 = vmatprep.subr.mxu1 %v433_v48 }
 0x12c   :  { %1001 = vmatpush3.msra.mxu0 %v289_v49  ;;  %1036 = vmatpush3.msra.mxu1 %v385_v50 }
 0x12d   :  { %1002 = vmatprep.subr.mxu0 %v334_v51  ;;  %1037 = vmatprep.subr.mxu1 %v430_v52 }
 0x12e   :  { %1003 = vmatpush3.msra.mxu0 %v286_v53  ;;  %1038 = vmatpush3.msra.mxu1 %v382_v54 }
 0x12f   :  { %832 = vmatmul.mubr.f32.vlgmr.msra.gmra.mxu0 %v280_v47  ;;  %902 = vmatmul.mubr.f32.vlgmr.msra.gmra.mxu1 %v282_v43  ;;  %v912_v47 = vrot.slane %v907_v62, %v1242_v27 }
 0x1ce   :  { %v691_v57 = vpop.f32.mrf.mxu0  ;;  %v762_v59 = vpop.f32.mrf.mxu1 }
 0x1cf   :  { %v692_v61 = vadd.f32 %v691_v57, %v550_v55 }
 0x1d0   :  { %v693_v58 = vpop.f32.mrf.mxu0  ;;  %v764_v63 = vpop.f32.mrf.mxu1 }
 0x1d1   :  { %v694_v60 = vadd.f32 %v693_v58, %v552_v56  ;;  %v763_v38 = vadd.f32 %v762_v59, %v692_v61 }
 0x1d3   :  { %v765_v0 = vadd.f32 %v764_v63, %v694_v60  ;;  %v924_v5 = vadd.f32 %v912_v47, %v763_v38 }
 0x1d5   :  { %v925_v2 = vadd.f32 %v916_v1, %v765_v0  ;;  %v927_v13 = vmax.f32 %v924_v5, 0.0 }
 0x1d7   :  { %v928_v9 = vmax.f32 %v925_v2, 0.0  ;;  %v947_v20 = vmul.f32 %v935_v15, %v927_v13 }
 0x1d9   :  { %v948_v18 = vmul.f32 %v939_v8, %v928_v9 }
 0x1db   :  { %v950_v22 = vadd.f32 %v948_v18, %v947_v20 }
 0x1ef   :  { %v1004_v37 = vpop.f32.mrf.mxu0  ;;  %v1039_v43 = vpop.f32.mrf.mxu1 }
 0x1f1   :  { %v1005_v3 = vpop.f32.mrf.mxu0  ;;  %v1040_v4 = vpop.f32.mrf.mxu1 }
 0x1f2   :  { %v1006_v6 = vadd.f32 %v1005_v3, %v1004_v37  ;;  %v1041_v11 = vadd.f32 %v1040_v4, %v1039_v43 }
 0x1f4   :  { %v834_v10 = vadd.f32 %v1006_v6, %v1257_v46 }
 0x1f6   :  { %v904_v14 = vadd.f32 %v1041_v11, %v834_v10 }
 0x1f8   :  { %v926_v16 = vadd.f32 %v920_v12, %v904_v14 }
 0x1fa   :  { %v929_v19 = vmax.f32 %v926_v16, 0.0 }
 0x1fc   :  { %v949_v21 = vmul.f32 %v943_v17, %v929_v19 }
 0x1fe   :  { %v951_v23 = vadd.f32 %v950_v22, %v949_v21 }
 0x200   :  { %952 = vadd.xlane.f32.xlu0 %v951_v23 }
 0x289   :  { %v953_v46 = vpop.xlane.xlu0 %952 }
 0x28a   :  { %v956_v24 = vadd.f32 %v955_v29, %v953_v46 }
 0x28c   :  { %958 = vst.msk [vmem:[%s1296_s9] sm:$0xff] %vm957_vm3, %v956_v24 }
 0x28d   :  { %963 = vsyncpa [#allocation4], 1 }
 0x28e   :  { %964 = vsyncpa [#allocation6], 1 }
 0x28f   :  { %965 = vsyncpa [#allocation9], 1 }

</bundles_post_ra>
